<compile_context>
chip_gen: v7x
topology: tpu7x:2x2x1
jax: 0.10.0
libtpu: 0.0.40
codegen_flags: <defaults>
</compile_context>

<pallas_src>
import jax
import jax.numpy as jnp
from jax.experimental import pallas as pl
from jax.experimental.pallas import tpu as pltpu


def _round_up(x: int, m: int) -> int:
    return (x + m - 1) // m * m


def _pick_tile(dim: int, max_tile: int, align: int):
    """Return (padded_dim, tile). tile divides padded_dim; tile is either the full
    (unpadded) dim (legal as a full-extent block) or a multiple of `align` <= max_tile."""
    if dim <= max_tile:
        return dim, dim                      # single full-dim block, no padding
    padded = _round_up(dim, align)
    tile = align
    t = align
    while t <= max_tile:
        if padded % t == 0:
            tile = t
        t += align
    return padded, tile


# ------------------------------- kernels -------------------------------------

def _quantize_rowsum_kernel(params_ref, x_ref, xq_ref, rs_ref):
    """Fake-quantize one (tm, tk) tile of x to integer-valued bf16 (zero-point already
    folded out) and accumulate the per-row integer sum for the w_zp correction."""
    k = pl.program_id(1)

    @pl.when(k == 0)
    def _():
        rs_ref[...] = jnp.zeros_like(rs_ref)

    inv_s = params_ref[0]          # 1 / act_scale
    zp = params_ref[1]             # activation zero point
    q = jnp.clip(jnp.round(x_ref[...] * inv_s) + zp, -128.0, 127.0) - zp
    xq_ref[...] = q.astype(jnp.bfloat16)               # exact: |q| <= 255
    rs_ref[...] += jnp.sum(q, axis=1, keepdims=True)


def _qlinear_matmul_kernel(params_ref, xq_ref, w_ref, rs_ref, b_ref, o_ref):
    """(tm, tk) x (tk, tn) bf16 MXU step accumulating straight into the resident f32
    output block; scale, zero-point correction and bias applied once at the last k."""
    k = pl.program_id(2)

    @pl.when(k == 0)
    def _():
        o_ref[...] = jnp.zeros_like(o_ref)

    o_ref[...] += jnp.dot(xq_ref[...], w_ref[...].astype(jnp.bfloat16),
                          preferred_element_type=jnp.float32)

    @pl.when(k == pl.num_programs(2) - 1)
    def _():
        w_zp = params_ref[2]
        out_scale = params_ref[3]                      # act_scale * w_scale
        acc = o_ref[...] - w_zp * rs_ref[...]          # fold weight zero point
        o_ref[...] = acc * out_scale + b_ref[...]


# ---------------------------- module wrapper ----------------------------------

class QuantizedLinearPallas:
    """Pallas-TPU equivalent of QuantizedLinear. The transposed/padded int8 weight,
    padded bias and packed quantization params are cached once here (set_weight time)."""

    def __init__(self, w_q, bias, *, act_scale, act_zp, w_scale, w_zp,
                 max_tm=256, max_tn=1024, max_tk=2048):
        N, K = w_q.shape
        self.N, self.K = int(N), int(K)
        self.max_tm = int(max_tm)
        self.Kp, self.tk = _pick_tile(self.K, int(max_tk), 128)
        self.Np, self.tn = _pick_tile(self.N, int(max_tn), 128)
        # Keep >= 2 blocks on the "parallel" j axis when alignment allows (v7x: 2 TCs).
        if self.Np // self.tn == 1 and self.tn % 256 == 0:
            self.tn //= 2

        # --- cached weight prep (done once, not per forward) ---
        w_kn = jnp.transpose(jnp.asarray(w_q, jnp.int8))            # (K, N) int8
        if (self.Kp, self.Np) != (self.K, self.N):
            # K-pad values are irrelevant: the padded activation rows quantize to exact 0.
            w_kn = jnp.pad(w_kn, ((0, self.Kp - self.K), (0, self.Np - self.N)))
        self.w_kn = w_kn

        if bias is None:
            bias = jnp.zeros((self.N,), jnp.float32)
        b = jnp.asarray(bias, jnp.float32)
        if self.Np != self.N:
            b = jnp.pad(b, (0, self.Np - self.N))
        self.bias_row = b.reshape(1, self.Np)

        # --- runtime quant params packed for SMEM (no float() host sync; traced OK) ---
        act_scale = jnp.asarray(act_scale, jnp.float32)
        act_zp = jnp.asarray(act_zp, jnp.float32)
        w_scale = jnp.asarray(w_scale, jnp.float32)
        w_zp = jnp.asarray(w_zp, jnp.float32)
        self.params = jnp.stack([1.0 / act_scale, act_zp, w_zp, act_scale * w_scale])

    def __call__(self, x):
        lead = x.shape[:-1]
        assert x.shape[-1] == self.K
        x2 = jnp.asarray(x, jnp.float32).reshape(-1, self.K)
        M = x2.shape[0]
        Mp, tm = _pick_tile(M, self.max_tm, 8)
        Kp, Np, tk, tn = self.Kp, self.Np, self.tk, self.tn

        if (Mp, Kp) != (M, self.K):
            x2 = jnp.pad(x2, ((0, Mp - M), (0, Kp - self.K)))

        smem_spec = pl.BlockSpec(memory_space=pltpu.MemorySpace.SMEM)

        # ---- prologue: fake-quant once per element (not once per (i,j,k) step) ----
        xq, rowsum = pl.pallas_call(
            _quantize_rowsum_kernel,
            out_shape=(jax.ShapeDtypeStruct((Mp, Kp), jnp.bfloat16),
                       jax.ShapeDtypeStruct((Mp, 1), jnp.float32)),
            grid_spec=pltpu.PrefetchScalarGridSpec(
                num_scalar_prefetch=0,
                grid=(Mp // tm, Kp // tk),
                in_specs=[smem_spec,
                          pl.BlockSpec((tm, tk), lambda i, k: (i, k))],
                out_specs=(pl.BlockSpec((tm, tk), lambda i, k: (i, k)),
                           pl.BlockSpec((tm, 1), lambda i, k: (i, 0)))),
            compiler_params=pltpu.CompilerParams(
                dimension_semantics=("parallel", "arbitrary"),
                vmem_limit_bytes=32 * 1024 * 1024),
        )(self.params, x2)

        # ---- main bf16 MXU matmul: K innermost, accumulate into resident o block ----
        out = pl.pallas_call(
            _qlinear_matmul_kernel,
            out_shape=jax.ShapeDtypeStruct((Mp, Np), jnp.float32),
            grid_spec=pltpu.PrefetchScalarGridSpec(
                num_scalar_prefetch=0,
                grid=(Mp // tm, Np // tn, Kp // tk),
                in_specs=[smem_spec,
                          pl.BlockSpec((tm, tk), lambda i, j, k: (i, k)),   # Xi  bf16
                          pl.BlockSpec((tk, tn), lambda i, j, k: (k, j)),   # Wq  int8 (K,N)
                          pl.BlockSpec((tm, 1), lambda i, j, k: (i, 0)),    # rowsum(Xi)
                          pl.BlockSpec((1, tn), lambda i, j, k: (0, j))],   # bias row
                out_specs=pl.BlockSpec((tm, tn), lambda i, j, k: (i, j))),
            compiler_params=pltpu.CompilerParams(
                dimension_semantics=("parallel", "parallel", "arbitrary"),
                vmem_limit_bytes=32 * 1024 * 1024),
            cost_estimate=pl.CostEstimate(
                flops=2 * Mp * Np * Kp,
                transcendentals=0,
                bytes_accessed=Mp * Kp * 2 + Kp * Np + Mp * Np * 4 + Np * 4 + Mp * 4),
        )(self.params, xq, self.w_kn, rowsum, self.bias_row)

        if (Mp, Np) != (M, self.N):
            out = out[:M, :self.N]
        return out.reshape(*lead, self.N)


if __name__ == "__main__":
    # Deterministic synthetic parameters (mirrors QuantizedLinear.__init__ / set_weight).
    in_features, out_features, batch = 32, 16, 8

    key = jax.random.PRNGKey(0)
    kx, kw, kb = jax.random.split(key, 3)

    x = jax.random.normal(kx, (batch, in_features), dtype=jnp.float32)
    w_float = jax.random.normal(kw, (out_features, in_features), dtype=jnp.float32) * 0.1
    bias = jax.random.normal(kb, (out_features,), dtype=jnp.float32) * 0.01

    # --- symmetric case (zero points = 0), as produced by per_tensor_symmetric observer ---
    activation_scale, activation_zero_point = 0.02, 0
    weight_scale, weight_zero_point = 0.005, 0

    # set_weight(): quantize float weight to qint8 values and store packed.
    w_q = jnp.clip(jnp.round(w_float / weight_scale) + weight_zero_point,
                   -128, 127).astype(jnp.int8)

    layer = QuantizedLinearPallas(
        w_q, bias,
        act_scale=activation_scale, act_zp=activation_zero_point,
        w_scale=weight_scale, w_zp=weight_zero_point)
    out = layer(x)
    jax.block_until_ready(out)

    x_dq = (jnp.clip(jnp.round(x / activation_scale) + activation_zero_point, -128, 127)
            - activation_zero_point) * activation_scale
    w_dq = (w_q.astype(jnp.float32) - weight_zero_point) * weight_scale
    ref = jnp.dot(x_dq, w_dq.T, precision=jax.lax.Precision.HIGHEST) + bias
    assert jnp.allclose(out, ref, atol=1e-4, rtol=1e-4), "mismatch vs reference (symmetric)"

    # --- affine case (nonzero zero points), exercises the rowsum correction path ---
    a_s2, a_zp2, w_s2, w_zp2 = 0.03, 3, 0.004, -5
    w_q2 = jnp.clip(jnp.round(w_float / w_s2) + w_zp2, -128, 127).astype(jnp.int8)
    layer2 = QuantizedLinearPallas(w_q2, None, act_scale=a_s2, act_zp=a_zp2,
                                   w_scale=w_s2, w_zp=w_zp2)
    out2 = layer2(x)
    jax.block_until_ready(out2)

    x_dq2 = (jnp.clip(jnp.round(x / a_s2) + a_zp2, -128, 127) - a_zp2) * a_s2
    w_dq2 = (w_q2.astype(jnp.float32) - w_zp2) * w_s2
    ref2 = jnp.dot(x_dq2, w_dq2.T, precision=jax.lax.Precision.HIGHEST)
    assert jnp.allclose(out2, ref2, atol=1e-4, rtol=1e-4), "mismatch vs reference (affine)"

    print("KERNEL_OK")
</pallas_src>

<mosaic_0001>
module attributes {stable_mosaic.version = 11 : i64} {
  func.func @_quantize_rowsum_kernel(%arg0: i32, %arg1: i32, %arg2: memref<4xf32, #tpu.memory_space<smem>>, %arg3: memref<8x32xf32, #tpu.memory_space<vmem>>, %arg4: memref<8x32xbf16, #tpu.memory_space<vmem>>, %arg5: memref<8x1xf32, #tpu.memory_space<vmem>>) attributes {dimension_semantics = [#tpu.dimension_semantics<parallel>, #tpu.dimension_semantics<arbitrary>], iteration_bounds = array<i64: 1, 1>, scalar_prefetch = 0 : i64, scratch_operands = 0 : i64, tpu.core_type = #tpu.core_type<tc>, window_params = [{transform_indices = @transform_0, window_bounds = array<i64: 4>}, {transform_indices = @transform_1, window_bounds = array<i64: 8, 32>}, {transform_indices = @transform_2, window_bounds = array<i64: 8, 32>}, {transform_indices = @transform_3, window_bounds = array<i64: 8, 1>}]} {
    %c0_i32 = arith.constant 0 : i32
    %0 = arith.cmpi eq, %arg1, %c0_i32 : i32
    %1 = arith.extui %0 : i1 to i32
    %c0_i32_0 = arith.constant 0 : i32
    %2 = arith.cmpi ne, %1, %c0_i32_0 : i32
    scf.if %2 {
      %cst_11 = arith.constant 0.000000e+00 : f32
      %24 = vector.broadcast %cst_11 : f32 to vector<8x1xf32>
      %c0_12 = arith.constant 0 : index
      %c0_13 = arith.constant 0 : index
      %25 = vector.load %arg5[%c0_12, %c0_13] : memref<8x1xf32, #tpu.memory_space<vmem>>, vector<8x1xf32>
      tpu.vector_store %arg5[%c0_12, %c0_13], %24 {strides = array<i32>} : memref<8x1xf32, #tpu.memory_space<vmem>>, vector<8x1xf32>,
    } else {
    }
    %c0 = arith.constant 0 : index
    %3 = memref.load %arg2[%c0] : memref<4xf32, #tpu.memory_space<smem>>
    %c1 = arith.constant 1 : index
    %4 = memref.load %arg2[%c1] : memref<4xf32, #tpu.memory_space<smem>>
    %c0_1 = arith.constant 0 : index
    %c0_2 = arith.constant 0 : index
    %5 = vector.load %arg3[%c0_1, %c0_2] : memref<8x32xf32, #tpu.memory_space<vmem>>, vector<8x32xf32>
    %6 = vector.broadcast %3 : f32 to vector<8x32xf32>
    %7 = arith.mulf %5, %6 : vector<8x32xf32>
    %8 = math.roundeven %7 : vector<8x32xf32>
    %9 = vector.broadcast %4 : f32 to vector<8x32xf32>
    %10 = arith.addf %8, %9 : vector<8x32xf32>
    %cst = arith.constant -1.280000e+02 : f32
    %cst_3 = arith.constant 1.270000e+02 : f32
    %11 = vector.broadcast %cst : f32 to vector<8x32xf32>
    %12 = arith.maximumf %11, %10 : vector<8x32xf32>
    %13 = vector.broadcast %cst_3 : f32 to vector<8x32xf32>
    %14 = arith.minimumf %13, %12 : vector<8x32xf32>
    %15 = vector.broadcast %4 : f32 to vector<8x32xf32>
    %16 = arith.subf %14, %15 : vector<8x32xf32>
    %17 = arith.truncf %16 : vector<8x32xf32> to vector<8x32xbf16>
    %c0_4 = arith.constant 0 : index
    %c0_5 = arith.constant 0 : index
    %18 = vector.load %arg4[%c0_4, %c0_5] : memref<8x32xbf16, #tpu.memory_space<vmem>>, vector<8x32xbf16>
    tpu.vector_store %arg4[%c0_4, %c0_5], %17 {strides = array<i32>} : memref<8x32xbf16, #tpu.memory_space<vmem>>, vector<8x32xbf16>,
    %c0_6 = arith.constant 0 : index
    %c0_7 = arith.constant 0 : index
    %19 = vector.load %arg5[%c0_6, %c0_7] : memref<8x1xf32, #tpu.memory_space<vmem>>, vector<8x1xf32>
    %cst_8 = arith.constant dense<0.000000e+00> : vector<8xf32>
    %20 = vector.multi_reduction <add>, %16, %cst_8 [1] : vector<8x32xf32> to vector<8xf32>
    %21 = vector.shape_cast %20 : vector<8xf32> to vector<8x1xf32>
    %22 = arith.addf %19, %21 : vector<8x1xf32>
    %c0_9 = arith.constant 0 : index
    %c0_10 = arith.constant 0 : index
    %23 = vector.load %arg5[%c0_9, %c0_10] : memref<8x1xf32, #tpu.memory_space<vmem>>, vector<8x1xf32>
    tpu.vector_store %arg5[%c0_9, %c0_10], %22 {strides = array<i32>} : memref<8x1xf32, #tpu.memory_space<vmem>>, vector<8x1xf32>,
    return
  }
  func.func @transform_0(%arg0: i32, %arg1: i32) -> i32 {
    %c0_i32 = arith.constant 0 : i32
    %c0_i32_0 = arith.constant 0 : i32
    return %c0_i32 : i32
  }
  func.func @transform_1(%arg0: i32, %arg1: i32) -> (i32, i32) {
    %c0_i32 = arith.constant 0 : i32
    return %arg0, %arg1 : i32, i32
  }
  func.func @transform_2(%arg0: i32, %arg1: i32) -> (i32, i32) {
    %c0_i32 = arith.constant 0 : i32
    return %arg0, %arg1 : i32, i32
  }
  func.func @transform_3(%arg0: i32, %arg1: i32) -> (i32, i32) {
    %c0_i32 = arith.constant 0 : i32
    %c0_i32_0 = arith.constant 0 : i32
    return %arg0, %c0_i32 : i32, i32
  }
}

</mosaic_0001>

<bundles_post_ra>
// kernel: tpu_custom_call.1
= control target key start
LH: loop header
LB: loop body
LE: loop exit
PB: predicated region body
PF: predicated region fallthrough
CT: control target
= control target key end

     0   :  { %9 = vsyncpa [#allocation5], 0  ;;  %s222_s0 = inlined_call_operand.hbm [shape: f32[4], index: 0, kind: input, shape index: {}]   ;;  %s223_s1 = inlined_call_operand.hbm [shape: f32[8,32], index: 1, kind: input, shape index: {}]   ;;  %s224_s2 = inlined_call_operand.hbm [shape: bf16[8,32], index: 2, kind: output, shape index: {0}]   ;;  %s225_s3 = inlined_call_operand.vmem [shape: f32[8,1], index: 3, kind: output, shape index: {1}]  }
   0x1   :  { %10 = vsyncpa [#allocation3], 0 }
   0x2   :  { %11 = vsyncpa [#allocation4], 0  ;;  %s91_s14 = scalar_lea.hbm %s222_s0, 16 }
   0x3   :  { %p92_p0 = scmp.ne.s32.totalorder %s222_s0, %s91_s14  ;;  %p95_p1 = scmp.lt.u32.totalorder %s91_s14, %s222_s0 }
   0x5   :  { %p97_p2 = pnand %p95_p1, %p92_p0 }
   0x7   :  { %100 = shalt.err (!%p97_p2)
}
   0x8   :  { %s151_s19 = smov [#allocation2]   ;;  %s152_s22 = smov [#allocation6]  }
   0x9   :  { %19 = dma.hbm_to_smem %s222_s0, 16, %s151_s19, [#allocation5]  }
   0xa   :  { %s26_s23 = sshll.u32 %s152_s22, 4  ;;  %s101_s26 = scalar_lea.hbm %s223_s1, 128  ;;  %s27_s23 = int_to_ptr.vmem [resolvable:$true] %s26_s23 }
   0xb   :  { %p102_p3 = scmp.ne.s32.totalorder %s223_s1, %s101_s26  ;;  %p105_p4 = scmp.lt.u32.totalorder %s101_s26, %s223_s1 }
   0xd   :  { %p107_p5 = pnand %p105_p4, %p102_p3 }
   0xf   :  { %110 = shalt.err (!%p107_p5)
}
  0x10   :  { %s111_s4 = scalar_lea.vmem %s27_s23, 128  ;;  %p116_p7 = scmp.lt.s32.totalorder %s27_s23, %s27_s23 }
  0x11   :  { %p112_p6 = scmp.ne.s32.totalorder %s27_s23, %s111_s4  ;;  %p117_p8 = scmp.lt.s32.totalorder %s111_s4, %s111_s4 }
  0x13   :  { %p118_p9 = por %p117_p8, %p116_p7 }
  0x15   :  { %p119_p10 = pnand %p118_p9, %p112_p6 }
  0x17   :  { %122 = shalt.err (!%p119_p10)
}
  0x18   :  { %29 = dma.hbm_to_vmem [thread:$0]  %s223_s1, 128, %s27_s23, [#allocation3]  }
  0x19   :  { %145 = dma.done.wait [#allocation5], 16  }
  0x1a   :  { %146 = vsyncadd [#allocation5], 4294967280 }
  0x1b   :  { %147 = dma.done.wait [#allocation3], 128  }
  0x1c   :  { %148 = vsyncadd [#allocation3], 4294967168 }
  0x1d   :  { %36 = sfence }
  0x1e   :  { %s43_s6 = sld [smem:[#allocation2]]  ;;  %s85_s7 = sld [smem:[#allocation2 + $0x1]]  ;;  %vm41_vm0 = vcmask 7168   ;;  %v153_v0 = vmov 0.0   ;;  %v45_v1 = vld [vmem:[#allocation6] sm:$0xff]  ;;  %vm58_vm1 = vcmask 261120  }
  0x1f   :  { %42 = vst.msk [vmem:[%s225_s3] sm:$0xff] %vm41_vm0, %v153_v0  ;;  %vm55_vm2 = vcmask 257024   ;;  %s154_s1 = smov [#allocation7]  }
  0x20   :  { %s71_s10 = sshll.u32 %s154_s1, 4  ;;  %s72_s10 = int_to_ptr.vmem [resolvable:$true] %s71_s10 }
  0x21   :  { %s123_s11 = scalar_lea.vmem %s72_s10, 64  ;;  %p128_p12 = scmp.lt.s32.totalorder %s72_s10, %s72_s10 }
  0x22   :  { %p124_p11 = scmp.ne.s32.totalorder %s72_s10, %s123_s11  ;;  %p129_p13 = scmp.lt.s32.totalorder %s123_s11, %s123_s11 }
  0x24   :  { %v46_v2 = vstv %s43_s6  ;;  %v49_v4 = vstv %s85_s7  ;;  %p130_p0 = por %p129_p13, %p128_p12 }
  0x25   :  { %v47_v3 = vmul.f32 %v46_v2, %v45_v1 }
  0x26   :  { %p131_p1 = pnand %p130_p0, %p124_p11 }
  0x27   :  { %v86_v5 = vround.rtne.f32 %v47_v3 }
  0x29   :  { %v50_v6 = vadd.f32 %v86_v5, %v49_v4 }
  0x2b   :  { %v51_v7 = vmax.f32 %v50_v6, -128.0 }
  0x2d   :  { %v52_v8 = vmin.f32 %v51_v7, 127.0 }
  0x2f   :  { %v53_v9 = vsub.f32 %v52_v8, %v49_v4 }
  0x31   :  { %v59_v10 = vsel %vm58_vm1, %v53_v9, 0.0  ;;  %v54_v11 = vpack.c.bf16 %v53_v9, %v53_v9 }
  0x32   :  { %60 = vadd.xlane.f32.xlu0 %v59_v10 }
  0x33   :  { %56 = vst.msk [vmem:[#allocation7] sm:$0xf] %vm55_vm2, %v54_v11 }
  0x34   :  { %134 = shalt.err (!%p131_p1)
}
  0x35   :  { %s135_s14 = scalar_lea.hbm %s224_s2, 64 }
  0x36   :  { %p136_p2 = scmp.ne.s32.totalorder %s224_s2, %s135_s14  ;;  %p139_p3 = scmp.lt.u32.totalorder %s135_s14, %s224_s2 }
  0x38   :  { %p141_p4 = pnand %p139_p3, %p136_p2 }
  0x3a   :  { %144 = shalt.err (!%p141_p4)
}
  0x3b   :  { %74 = dma.vmem_to_hbm [thread:$0]  %s72_s10, 64, %s224_s2, [#allocation4]   ;;  %v57_v12 = vld [vmem:[%s225_s3] sm:$0xff] }
  0xbf   :  { %v61_v13 = vpop.xlane.xlu0 %60 }
  0xc0   :  { %v62_v14 = vadd.f32 %v61_v13, %v57_v12 }
  0xc2   :  { %64 = vst.msk [vmem:[%s225_s3] sm:$0xff] %vm41_vm0, %v62_v14 }
  0xc3   :  { %149 = dma.done.wait [#allocation4], 64  }
  0xc4   :  { %150 = vsyncadd [#allocation4], 4294967232 }
  0xc5   :  { %82 = vsyncpa [#allocation3], 1 }
  0xc6   :  { %83 = vsyncpa [#allocation4], 1 }
  0xc7   :  { %84 = vsyncpa [#allocation5], 1 }

</bundles_post_ra>
